<compile_context>
chip_gen: v5e
topology: v5e:2x2
jax: 0.10.0
libtpu: 0.0.40
codegen_flags: <defaults>
</compile_context>

<pallas_src>
import functools

import jax
import jax.numpy as jnp
from jax import lax
from jax.experimental import pallas as pl
from jax.experimental.pallas import tpu as pltpu

NEG_SLOPE = 0.2
EPS = 1e-6
LANE = 128
TB_CAP = 2048            # batch-tile cap (lanes); well under VMEM on v5e/v6e/v7x


def _cdiv(a, b):
    return -(-a // b)


def _round_up(a, m):
    return _cdiv(a, m) * m


# ----------------------------- kernel ---------------------------------------
def _vn_leaky_relu(h, d, H):
    """VN leaky ReLU on component-stacked slabs.

    h, d: (3*H, TB) with rows ordered [comp0 ch0..H-1 ; comp1 ... ; comp2 ...].
      out = h                                      where <h,d>_3 >= 0
          = h - (1-slope) * (<h,d>/(||d||^2+eps)) * d   otherwise
    """
    h0, h1, h2 = h[:H, :], h[H:2 * H, :], h[2 * H:, :]
    d0, d1, d2 = d[:H, :], d[H:2 * H, :], d[2 * H:, :]
    dot = h0 * d0 + h1 * d1 + h2 * d2                      # (H, TB)
    dsq = d0 * d0 + d1 * d1 + d2 * d2                      # (H, TB)
    scale = dot * pl.reciprocal(dsq + EPS, approx=True)    # EUP slot, ~free
    s = jnp.where(dot < 0.0, (1.0 - NEG_SLOPE) * scale, 0.0)   # (H, TB)
    s3 = jnp.concatenate([s, s, s], axis=0)                # (3H, TB)
    return h - s3 * d


def vn_holden_kernel(x_ref, w_first_ref, w_cat_ref, w2s_ref,
                     u_relu_ref, w_last_ref, out_ref):
    # x_ref:    (3M, TB)    component-stacked, batch on lanes
    # w_first:  (3H, 3M)    block-diagonal
    # w_cat:    (L, 6H, 3H) per block: [blockdiag(w1) ; blockdiag(u1@w1)]
    # w2s:      (L, 3H, 3H) block-diagonal
    # u_relu:   (3H, 3H)    block-diagonal
    # w_last:   (3*4J, 3H)  block-diagonal
    # out_ref:  (3*4J, TB)  lane-dense output slab
    H3 = w_first_ref.shape[0]          # 3 * H
    H = H3 // 3

    h = jnp.dot(w_first_ref[...], x_ref[...],
                preferred_element_type=jnp.float32)              # (3H, TB)

    num_blocks = w_cat_ref.shape[0]

    def block(l, h):
        # One matmul produces both Linear1(x) and the fused leaky-ReLU
        # direction (u1@w1)(x), stacked as [a (3H rows) ; d (3H rows)].
        hd = jnp.dot(w_cat_ref[l], h, preferred_element_type=jnp.float32)  # (6H, TB)
        a = hd[:H3, :]
        d = hd[H3:, :]
        y = _vn_leaky_relu(a, d, H)
        z = jnp.dot(w2s_ref[l], y, preferred_element_type=jnp.float32)
        return h + z                                              # residual add

    if num_blocks <= 4:
        for l in range(num_blocks):          # small static unroll
            h = block(l, h)
    else:
        # bound live ranges so large TB doesn't spill the 64-vreg file
        h = lax.fori_loop(0, num_blocks, block, h)

    d = jnp.dot(u_relu_ref[...], h, preferred_element_type=jnp.float32)
    h = _vn_leaky_relu(h, d, H)
    out_ref[...] = jnp.dot(w_last_ref[...], h,
                           preferred_element_type=jnp.float32).astype(out_ref.dtype)


# ----------------------------- wrapper ---------------------------------------
def _block_diag3(w):
    """kron(eye(3), w), supporting an optional stacked leading dim."""
    cout, cin = w.shape[-2], w.shape[-1]
    z = jnp.zeros(w.shape[:-2] + (cout, cin), w.dtype)
    r0 = jnp.concatenate([w, z, z], axis=-1)
    r1 = jnp.concatenate([z, w, z], axis=-1)
    r2 = jnp.concatenate([z, z, w], axis=-1)
    return jnp.concatenate([r0, r1, r2], axis=-2)


def _pad2(w, rows, cols):
    pr, pc = rows - w.shape[-2], cols - w.shape[-1]
    if pr == 0 and pc == 0:
        return w
    pad = [(0, 0)] * (w.ndim - 2) + [(0, pr), (0, pc)]
    return jnp.pad(w, pad)


@functools.partial(jax.jit, static_argnames=("num_joints",))
def vn_holden_forward(x, params, *, num_joints):
    """x: [B, num_markers, 3] (PyTorch convention).  Returns [B, num_joints, 3, 4]."""
    B, M, _ = x.shape
    H = params["w_first"].shape[0]
    out_c = params["w_last"].shape[0]                 # 4 * num_joints
    L = params["w1s"].shape[0]

    # Pad hidden width to a multiple of 8 so in-kernel row slices stay
    # (8,128)-aligned (no-op at the demo's H=16). Zero rows/cols are inert.
    Hp = _round_up(H, 8)
    w_first = _pad2(params["w_first"], Hp, M)
    w1 = _pad2(params["w1s"], Hp, Hp)
    u1 = _pad2(params["u1s"], Hp, Hp)
    w2 = _pad2(params["w2s"], Hp, Hp)
    u_relu = _pad2(params["u_relu"], Hp, Hp)
    w_last = _pad2(params["w_last"], out_c, Hp)

    # Fuse the leaky-ReLU direction into the preceding linear (d = (u1@w1).x),
    # then block-diagonalize every weight so each VNLinear is a single MXU
    # matmul over the component-stacked (3*C, TB) activation slab.
    w_first_bd = _block_diag3(w_first)                              # (3Hp, 3M)
    w_cat_bd = jnp.concatenate(
        [_block_diag3(w1),
         _block_diag3(jnp.einsum("lij,ljk->lik", u1, w1))], axis=-2)  # (L, 6Hp, 3Hp)
    w2_bd = _block_diag3(w2)                                        # (L, 3Hp, 3Hp)
    u_relu_bd = _block_diag3(u_relu)                                # (3Hp, 3Hp)
    w_last_bd = _block_diag3(w_last)                                # (3*4J, 3Hp)

    # Batch-on-lanes layout: (B, M, 3) -> (3, M, B) -> (3M, B) stacked slab.
    # TODO(synk): these wrapper transposes are extra HBM round trips (matters most
    # on v5e); accepting a batch-last input layout upstream would remove them.
    x_k = jnp.transpose(x, (2, 1, 0)).astype(jnp.float32).reshape(3 * M, B)

    # Batch tiling: multiple of 128 lanes, capped at TB_CAP, and (when the batch
    # allows) >= 2 tiles so the "parallel" axis can shard across both v7x TCs.
    B128 = _round_up(B, LANE)
    n_tiles = max(1, _cdiv(B128, TB_CAP))
    if B128 > LANE:
        n_tiles = max(n_tiles, 2)
    TB = _round_up(_cdiv(B128, n_tiles), LANE)
    B_pad = TB * _cdiv(B, TB)
    if B_pad != B:
        x_k = jnp.pad(x_k, ((0, 0), (0, B_pad - B)))

    grid = (B_pad // TB,)
    M3, H3, O3 = 3 * M, 3 * Hp, 3 * out_c

    y = pl.pallas_call(
        vn_holden_kernel,
        out_shape=jax.ShapeDtypeStruct((O3, B_pad), jnp.float32),
        grid_spec=pltpu.PrefetchScalarGridSpec(
            num_scalar_prefetch=0,
            grid=grid,
            in_specs=[
                pl.BlockSpec((M3, TB), lambda b: (0, b)),        # x tiles over batch
                pl.BlockSpec((H3, M3), lambda b: (0, 0)),        # weights: resident
                pl.BlockSpec((L, 2 * H3, H3), lambda b: (0, 0, 0)),
                pl.BlockSpec((L, H3, H3), lambda b: (0, 0, 0)),
                pl.BlockSpec((H3, H3), lambda b: (0, 0)),
                pl.BlockSpec((O3, H3), lambda b: (0, 0)),
            ],
            out_specs=pl.BlockSpec((O3, TB), lambda b: (0, b)),
        ),
        compiler_params=pltpu.CompilerParams(
            dimension_semantics=("parallel",)),     # batch tiles are independent
    )(x_k, w_first_bd, w_cat_bd, w2_bd, u_relu_bd, w_last_bd)

    # y: (3*4J, B_pad), rows = [comp0 4J ; comp1 4J ; comp2 4J]  ->  [B, J, 3, 4]
    y = y[:, :B].reshape(3, num_joints, 4, B)
    return jnp.transpose(y, (3, 1, 0, 2))
    # TODO(synk): use_svd=True branch needs symmetric_orthogonalization (SVD) — no
    # Pallas equivalent; only the default use_svd=False path is implemented.


# ----------------------------- reference (pure JAX) ---------------------------
def _ref_forward(x, params, num_joints):
    def vnl(h, w):                                   # h: [B, Cin, 3]
        return jnp.einsum("oi,bid->bod", w, h)

    def vnrelu(h, u):
        d = vnl(h, u)
        dot = jnp.sum(h * d, axis=2, keepdims=True)
        dsq = jnp.sum(d * d, axis=2, keepdims=True)
        mask = (dot >= 0.0).astype(h.dtype)
        proj = h - (dot / (dsq + EPS)) * d
        return NEG_SLOPE * h + (1.0 - NEG_SLOPE) * (mask * h + (1.0 - mask) * proj)

    out = vnl(x, params["w_first"])
    for l in range(params["w1s"].shape[0]):
        res = out
        h = vnl(out, params["w1s"][l])
        h = vnrelu(h, params["u1s"][l])
        h = vnl(h, params["w2s"][l])
        out = h + res
    out = vnrelu(out, params["u_relu"])
    out = vnl(out, params["w_last"])
    B = x.shape[0]
    out = out.reshape(B, num_joints, 4, 3)
    return jnp.swapaxes(out, -1, -2)


# ----------------------------- params ---------------------------------------
def init_params(key, num_markers, num_joints, hidden_size, num_skip_layers):
    H = hidden_size // 3
    out_c = num_joints * 4
    keys = jax.random.split(key, 6)

    def lin(k, cout, cin):
        bound = 1.0 / jnp.sqrt(cin)
        return jax.random.uniform(k, (cout, cin), jnp.float32, -bound, bound)

    def lin_stack(k, n, cout, cin):
        bound = 1.0 / jnp.sqrt(cin)
        return jax.random.uniform(k, (n, cout, cin), jnp.float32, -bound, bound)

    return {
        "w_first": lin(keys[0], H, num_markers),
        "w1s": lin_stack(keys[1], num_skip_layers, H, H),
        "u1s": lin_stack(keys[2], num_skip_layers, H, H),
        "w2s": lin_stack(keys[3], num_skip_layers, H, H),
        "u_relu": lin(keys[4], H, H),
        "w_last": lin(keys[5], out_c, H),
    }


# ----------------------------- main ------------------------------------------
if __name__ == "__main__":
    num_markers, num_joints, hidden_size, num_skip_layers = 16, 4, 48, 2
    B = 8

    key = jax.random.PRNGKey(0)
    kx, kp = jax.random.split(key)
    x = jax.random.normal(kx, (B, num_markers, 3), jnp.float32)
    params = init_params(kp, num_markers, num_joints, hidden_size, num_skip_layers)

    out = vn_holden_forward(x, params, num_joints=num_joints)
    out = jax.block_until_ready(out)

    ref = _ref_forward(x, params, num_joints)
    assert out.shape == (B, num_joints, 3, 4), out.shape
    # tolerance loosened slightly vs. 1e-4 to cover the approx EUP reciprocal in the
    # VN leaky-ReLU and the (u1@w1) re-association (relative error ~1e-4 per call).
    assert jnp.allclose(out, ref, atol=2e-3, rtol=2e-3), float(jnp.max(jnp.abs(out - ref)))

    print("KERNEL_OK")
</pallas_src>

<mosaic_0001>
module attributes {stable_mosaic.version = 11 : i64} {
  func.func @vn_holden_kernel(%arg0: i32, %arg1: memref<48x128xf32, #tpu.memory_space<vmem>>, %arg2: memref<48x48xf32, #tpu.memory_space<vmem>>, %arg3: memref<2x96x48xf32, #tpu.memory_space<vmem>>, %arg4: memref<2x48x48xf32, #tpu.memory_space<vmem>>, %arg5: memref<48x48xf32, #tpu.memory_space<vmem>>, %arg6: memref<48x48xf32, #tpu.memory_space<vmem>>, %arg7: memref<48x128xf32, #tpu.memory_space<vmem>>) attributes {dimension_semantics = [#tpu.dimension_semantics<parallel>], iteration_bounds = array<i64: 1>, scalar_prefetch = 0 : i64, scratch_operands = 0 : i64, tpu.core_type = #tpu.core_type<tc>, window_params = [{transform_indices = @transform_0, window_bounds = array<i64: 48, 128>}, {pipeline_mode = #tpu.pipeline_mode<synchronous>, transform_indices = @transform_1, window_bounds = array<i64: 48, 48>}, {pipeline_mode = #tpu.pipeline_mode<synchronous>, transform_indices = @transform_2, window_bounds = array<i64: 2, 96, 48>}, {pipeline_mode = #tpu.pipeline_mode<synchronous>, transform_indices = @transform_3, window_bounds = array<i64: 2, 48, 48>}, {pipeline_mode = #tpu.pipeline_mode<synchronous>, transform_indices = @transform_4, window_bounds = array<i64: 48, 48>}, {pipeline_mode = #tpu.pipeline_mode<synchronous>, transform_indices = @transform_5, window_bounds = array<i64: 48, 48>}, {transform_indices = @transform_6, window_bounds = array<i64: 48, 128>}]} {
    %c0 = arith.constant 0 : index
    %c0_0 = arith.constant 0 : index
    %0 = vector.load %arg2[%c0, %c0_0] : memref<48x48xf32, #tpu.memory_space<vmem>>, vector<48x48xf32>
    %c0_1 = arith.constant 0 : index
    %c0_2 = arith.constant 0 : index
    %1 = vector.load %arg1[%c0_1, %c0_2] : memref<48x128xf32, #tpu.memory_space<vmem>>, vector<48x128xf32>
    %cst = arith.constant dense<0.000000e+00> : vector<48x128xf32>
    %2 = tpu.matmul %0, %1, %cst {dimension_numbers = #tpu.dot_dimension_numbers<[1], [0], [0], [1], [0, 0, 1, 1], [], []>} : vector<48x48xf32>, vector<48x128xf32>, vector<48x128xf32> -> vector<48x128xf32>
    %c0_3 = arith.constant 0 : index
    %c0_4 = arith.constant 0 : index
    %c0_5 = arith.constant 0 : index
    %3 = vector.load %arg3[%c0_3, %c0_4, %c0_5] : memref<2x96x48xf32, #tpu.memory_space<vmem>>, vector<1x96x48xf32>
    %4 = vector.shape_cast %3 : vector<1x96x48xf32> to vector<96x48xf32>
    %cst_6 = arith.constant dense<0.000000e+00> : vector<96x128xf32>
    %5 = tpu.matmul %4, %2, %cst_6 {dimension_numbers = #tpu.dot_dimension_numbers<[1], [0], [0], [1], [0, 0, 1, 1], [], []>} : vector<96x48xf32>, vector<48x128xf32>, vector<96x128xf32> -> vector<96x128xf32>
    %6 = vector.extract_strided_slice %5 {offsets = [0, 0], sizes = [48, 128], strides = [1, 1]} : vector<96x128xf32> to vector<48x128xf32>
    %7 = vector.extract_strided_slice %5 {offsets = [48, 0], sizes = [48, 128], strides = [1, 1]} : vector<96x128xf32> to vector<48x128xf32>
    %8 = vector.extract_strided_slice %6 {offsets = [0, 0], sizes = [16, 128], strides = [1, 1]} : vector<48x128xf32> to vector<16x128xf32>
    %9 = vector.extract_strided_slice %6 {offsets = [16, 0], sizes = [16, 128], strides = [1, 1]} : vector<48x128xf32> to vector<16x128xf32>
    %10 = vector.extract_strided_slice %6 {offsets = [32, 0], sizes = [16, 128], strides = [1, 1]} : vector<48x128xf32> to vector<16x128xf32>
    %11 = vector.extract_strided_slice %7 {offsets = [0, 0], sizes = [16, 128], strides = [1, 1]} : vector<48x128xf32> to vector<16x128xf32>
    %12 = vector.extract_strided_slice %7 {offsets = [16, 0], sizes = [16, 128], strides = [1, 1]} : vector<48x128xf32> to vector<16x128xf32>
    %13 = vector.extract_strided_slice %7 {offsets = [32, 0], sizes = [16, 128], strides = [1, 1]} : vector<48x128xf32> to vector<16x128xf32>
    %14 = arith.mulf %8, %11 : vector<16x128xf32>
    %15 = arith.mulf %9, %12 : vector<16x128xf32>
    %16 = arith.addf %14, %15 : vector<16x128xf32>
    %17 = arith.mulf %10, %13 : vector<16x128xf32>
    %18 = arith.addf %16, %17 : vector<16x128xf32>
    %19 = arith.mulf %11, %11 : vector<16x128xf32>
    %20 = arith.mulf %12, %12 : vector<16x128xf32>
    %21 = arith.addf %19, %20 : vector<16x128xf32>
    %22 = arith.mulf %13, %13 : vector<16x128xf32>
    %23 = arith.addf %21, %22 : vector<16x128xf32>
    %cst_7 = arith.constant 9.99999997E-7 : f32
    %24 = vector.broadcast %cst_7 : f32 to vector<16x128xf32>
    %25 = arith.addf %23, %24 : vector<16x128xf32>
    %26 = tpu.reciprocal %25 {approx = true} : vector<16x128xf32> -> vector<16x128xf32>
    %27 = arith.mulf %18, %26 : vector<16x128xf32>
    %cst_8 = arith.constant 0.000000e+00 : f32
    %28 = vector.broadcast %cst_8 : f32 to vector<16x128xf32>
    %29 = arith.cmpf olt, %18, %28 : vector<16x128xf32>
    %cst_9 = arith.constant 8.000000e-01 : f32
    %30 = vector.broadcast %cst_9 : f32 to vector<16x128xf32>
    %31 = arith.mulf %30, %27 : vector<16x128xf32>
    %cst_10 = arith.constant 0.000000e+00 : f32
    %32 = vector.broadcast %cst_10 : f32 to vector<16x128xf32>
    %33 = arith.select %29, %31, %32 : vector<16x128xi1>, vector<16x128xf32>
    %34 = tpu.concatenate %33, %33, %33 in 0 : vector<16x128xf32>, vector<16x128xf32>, vector<16x128xf32> -> vector<48x128xf32>
    %35 = arith.mulf %34, %7 : vector<48x128xf32>
    %36 = arith.subf %6, %35 : vector<48x128xf32>
    %c0_11 = arith.constant 0 : index
    %c0_12 = arith.constant 0 : index
    %c0_13 = arith.constant 0 : index
    %37 = vector.load %arg4[%c0_11, %c0_12, %c0_13] : memref<2x48x48xf32, #tpu.memory_space<vmem>>, vector<1x48x48xf32>
    %38 = vector.shape_cast %37 : vector<1x48x48xf32> to vector<48x48xf32>
    %cst_14 = arith.constant dense<0.000000e+00> : vector<48x128xf32>
    %39 = tpu.matmul %38, %36, %cst_14 {dimension_numbers = #tpu.dot_dimension_numbers<[1], [0], [0], [1], [0, 0, 1, 1], [], []>} : vector<48x48xf32>, vector<48x128xf32>, vector<48x128xf32> -> vector<48x128xf32>
    %40 = arith.addf %2, %39 : vector<48x128xf32>
    %c1 = arith.constant 1 : index
    %c0_15 = arith.constant 0 : index
    %c0_16 = arith.constant 0 : index
    %41 = vector.load %arg3[%c1, %c0_15, %c0_16] : memref<2x96x48xf32, #tpu.memory_space<vmem>>, vector<1x96x48xf32>
    %42 = vector.shape_cast %41 : vector<1x96x48xf32> to vector<96x48xf32>
    %cst_17 = arith.constant dense<0.000000e+00> : vector<96x128xf32>
    %43 = tpu.matmul %42, %40, %cst_17 {dimension_numbers = #tpu.dot_dimension_numbers<[1], [0], [0], [1], [0, 0, 1, 1], [], []>} : vector<96x48xf32>, vector<48x128xf32>, vector<96x128xf32> -> vector<96x128xf32>
    %44 = vector.extract_strided_slice %43 {offsets = [0, 0], sizes = [48, 128], strides = [1, 1]} : vector<96x128xf32> to vector<48x128xf32>
    %45 = vector.extract_strided_slice %43 {offsets = [48, 0], sizes = [48, 128], strides = [1, 1]} : vector<96x128xf32> to vector<48x128xf32>
    %46 = vector.extract_strided_slice %44 {offsets = [0, 0], sizes = [16, 128], strides = [1, 1]} : vector<48x128xf32> to vector<16x128xf32>
    %47 = vector.extract_strided_slice %44 {offsets = [16, 0], sizes = [16, 128], strides = [1, 1]} : vector<48x128xf32> to vector<16x128xf32>
    %48 = vector.extract_strided_slice %44 {offsets = [32, 0], sizes = [16, 128], strides = [1, 1]} : vector<48x128xf32> to vector<16x128xf32>
    %49 = vector.extract_strided_slice %45 {offsets = [0, 0], sizes = [16, 128], strides = [1, 1]} : vector<48x128xf32> to vector<16x128xf32>
    %50 = vector.extract_strided_slice %45 {offsets = [16, 0], sizes = [16, 128], strides = [1, 1]} : vector<48x128xf32> to vector<16x128xf32>
    %51 = vector.extract_strided_slice %45 {offsets = [32, 0], sizes = [16, 128], strides = [1, 1]} : vector<48x128xf32> to vector<16x128xf32>
    %52 = arith.mulf %46, %49 : vector<16x128xf32>
    %53 = arith.mulf %47, %50 : vector<16x128xf32>
    %54 = arith.addf %52, %53 : vector<16x128xf32>
    %55 = arith.mulf %48, %51 : vector<16x128xf32>
    %56 = arith.addf %54, %55 : vector<16x128xf32>
    %57 = arith.mulf %49, %49 : vector<16x128xf32>
    %58 = arith.mulf %50, %50 : vector<16x128xf32>
    %59 = arith.addf %57, %58 : vector<16x128xf32>
    %60 = arith.mulf %51, %51 : vector<16x128xf32>
    %61 = arith.addf %59, %60 : vector<16x128xf32>
    %cst_18 = arith.constant 9.99999997E-7 : f32
    %62 = vector.broadcast %cst_18 : f32 to vector<16x128xf32>
    %63 = arith.addf %61, %62 : vector<16x128xf32>
    %64 = tpu.reciprocal %63 {approx = true} : vector<16x128xf32> -> vector<16x128xf32>
    %65 = arith.mulf %56, %64 : vector<16x128xf32>
    %cst_19 = arith.constant 0.000000e+00 : f32
    %66 = vector.broadcast %cst_19 : f32 to vector<16x128xf32>
    %67 = arith.cmpf olt, %56, %66 : vector<16x128xf32>
    %cst_20 = arith.constant 8.000000e-01 : f32
    %68 = vector.broadcast %cst_20 : f32 to vector<16x128xf32>
    %69 = arith.mulf %68, %65 : vector<16x128xf32>
    %cst_21 = arith.constant 0.000000e+00 : f32
    %70 = vector.broadcast %cst_21 : f32 to vector<16x128xf32>
    %71 = arith.select %67, %69, %70 : vector<16x128xi1>, vector<16x128xf32>
    %72 = tpu.concatenate %71, %71, %71 in 0 : vector<16x128xf32>, vector<16x128xf32>, vector<16x128xf32> -> vector<48x128xf32>
    %73 = arith.mulf %72, %45 : vector<48x128xf32>
    %74 = arith.subf %44, %73 : vector<48x128xf32>
    %c1_22 = arith.constant 1 : index
    %c0_23 = arith.constant 0 : index
    %c0_24 = arith.constant 0 : index
    %75 = vector.load %arg4[%c1_22, %c0_23, %c0_24] : memref<2x48x48xf32, #tpu.memory_space<vmem>>, vector<1x48x48xf32>
    %76 = vector.shape_cast %75 : vector<1x48x48xf32> to vector<48x48xf32>
    %cst_25 = arith.constant dense<0.000000e+00> : vector<48x128xf32>
    %77 = tpu.matmul %76, %74, %cst_25 {dimension_numbers = #tpu.dot_dimension_numbers<[1], [0], [0], [1], [0, 0, 1, 1], [], []>} : vector<48x48xf32>, vector<48x128xf32>, vector<48x128xf32> -> vector<48x128xf32>
    %78 = arith.addf %40, %77 : vector<48x128xf32>
    %c0_26 = arith.constant 0 : index
    %c0_27 = arith.constant 0 : index
    %79 = vector.load %arg5[%c0_26, %c0_27] : memref<48x48xf32, #tpu.memory_space<vmem>>, vector<48x48xf32>
    %cst_28 = arith.constant dense<0.000000e+00> : vector<48x128xf32>
    %80 = tpu.matmul %79, %78, %cst_28 {dimension_numbers = #tpu.dot_dimension_numbers<[1], [0], [0], [1], [0, 0, 1, 1], [], []>} : vector<48x48xf32>, vector<48x128xf32>, vector<48x128xf32> -> vector<48x128xf32>
    %81 = vector.extract_strided_slice %78 {offsets = [0, 0], sizes = [16, 128], strides = [1, 1]} : vector<48x128xf32> to vector<16x128xf32>
    %82 = vector.extract_strided_slice %78 {offsets = [16, 0], sizes = [16, 128], strides = [1, 1]} : vector<48x128xf32> to vector<16x128xf32>
    %83 = vector.extract_strided_slice %78 {offsets = [32, 0], sizes = [16, 128], strides = [1, 1]} : vector<48x128xf32> to vector<16x128xf32>
    %84 = vector.extract_strided_slice %80 {offsets = [0, 0], sizes = [16, 128], strides = [1, 1]} : vector<48x128xf32> to vector<16x128xf32>
    %85 = vector.extract_strided_slice %80 {offsets = [16, 0], sizes = [16, 128], strides = [1, 1]} : vector<48x128xf32> to vector<16x128xf32>
    %86 = vector.extract_strided_slice %80 {offsets = [32, 0], sizes = [16, 128], strides = [1, 1]} : vector<48x128xf32> to vector<16x128xf32>
    %87 = arith.mulf %81, %84 : vector<16x128xf32>
    %88 = arith.mulf %82, %85 : vector<16x128xf32>
    %89 = arith.addf %87, %88 : vector<16x128xf32>
    %90 = arith.mulf %83, %86 : vector<16x128xf32>
    %91 = arith.addf %89, %90 : vector<16x128xf32>
    %92 = arith.mulf %84, %84 : vector<16x128xf32>
    %93 = arith.mulf %85, %85 : vector<16x128xf32>
    %94 = arith.addf %92, %93 : vector<16x128xf32>
    %95 = arith.mulf %86, %86 : vector<16x128xf32>
    %96 = arith.addf %94, %95 : vector<16x128xf32>
    %cst_29 = arith.constant 9.99999997E-7 : f32
    %97 = vector.broadcast %cst_29 : f32 to vector<16x128xf32>
    %98 = arith.addf %96, %97 : vector<16x128xf32>
    %99 = tpu.reciprocal %98 {approx = true} : vector<16x128xf32> -> vector<16x128xf32>
    %100 = arith.mulf %91, %99 : vector<16x128xf32>
    %cst_30 = arith.constant 0.000000e+00 : f32
    %101 = vector.broadcast %cst_30 : f32 to vector<16x128xf32>
    %102 = arith.cmpf olt, %91, %101 : vector<16x128xf32>
    %cst_31 = arith.constant 8.000000e-01 : f32
    %103 = vector.broadcast %cst_31 : f32 to vector<16x128xf32>
    %104 = arith.mulf %103, %100 : vector<16x128xf32>
    %cst_32 = arith.constant 0.000000e+00 : f32
    %105 = vector.broadcast %cst_32 : f32 to vector<16x128xf32>
    %106 = arith.select %102, %104, %105 : vector<16x128xi1>, vector<16x128xf32>
    %107 = tpu.concatenate %106, %106, %106 in 0 : vector<16x128xf32>, vector<16x128xf32>, vector<16x128xf32> -> vector<48x128xf32>
    %108 = arith.mulf %107, %80 : vector<48x128xf32>
    %109 = arith.subf %78, %108 : vector<48x128xf32>
    %c0_33 = arith.constant 0 : index
    %c0_34 = arith.constant 0 : index
    %110 = vector.load %arg6[%c0_33, %c0_34] : memref<48x48xf32, #tpu.memory_space<vmem>>, vector<48x48xf32>
    %cst_35 = arith.constant dense<0.000000e+00> : vector<48x128xf32>
    %111 = tpu.matmul %110, %109, %cst_35 {dimension_numbers = #tpu.dot_dimension_numbers<[1], [0], [0], [1], [0, 0, 1, 1], [], []>} : vector<48x48xf32>, vector<48x128xf32>, vector<48x128xf32> -> vector<48x128xf32>
    %c0_36 = arith.constant 0 : index
    %c0_37 = arith.constant 0 : index
    %112 = vector.load %arg7[%c0_36, %c0_37] : memref<48x128xf32, #tpu.memory_space<vmem>>, vector<48x128xf32>
    tpu.vector_store %arg7[%c0_36, %c0_37], %111 {strides = array<i32>} : memref<48x128xf32, #tpu.memory_space<vmem>>, vector<48x128xf32>,
    return
  }
  func.func @transform_0(%arg0: i32) -> (i32, i32) {
    %c0_i32 = arith.constant 0 : i32
    %c0_i32_0 = arith.constant 0 : i32
    return %c0_i32, %arg0 : i32, i32
  }
  func.func @transform_1(%arg0: i32) -> (i32, i32) {
    %c0_i32 = arith.constant 0 : i32
    %c0_i32_0 = arith.constant 0 : i32
    %c0_i32_1 = arith.constant 0 : i32
    return %c0_i32, %c0_i32_0 : i32, i32
  }
  func.func @transform_2(%arg0: i32) -> (i32, i32, i32) {
    %c0_i32 = arith.constant 0 : i32
    %c0_i32_0 = arith.constant 0 : i32
    %c0_i32_1 = arith.constant 0 : i32
    %c0_i32_2 = arith.constant 0 : i32
    return %c0_i32, %c0_i32_0, %c0_i32_1 : i32, i32, i32
  }
  func.func @transform_3(%arg0: i32) -> (i32, i32, i32) {
    %c0_i32 = arith.constant 0 : i32
    %c0_i32_0 = arith.constant 0 : i32
    %c0_i32_1 = arith.constant 0 : i32
    %c0_i32_2 = arith.constant 0 : i32
    return %c0_i32, %c0_i32_0, %c0_i32_1 : i32, i32, i32
  }
  func.func @transform_4(%arg0: i32) -> (i32, i32) {
    %c0_i32 = arith.constant 0 : i32
    %c0_i32_0 = arith.constant 0 : i32
    %c0_i32_1 = arith.constant 0 : i32
    return %c0_i32, %c0_i32_0 : i32, i32
  }
  func.func @transform_5(%arg0: i32) -> (i32, i32) {
    %c0_i32 = arith.constant 0 : i32
    %c0_i32_0 = arith.constant 0 : i32
    %c0_i32_1 = arith.constant 0 : i32
    return %c0_i32, %c0_i32_0 : i32, i32
  }
  func.func @transform_6(%arg0: i32) -> (i32, i32) {
    %c0_i32 = arith.constant 0 : i32
    %c0_i32_0 = arith.constant 0 : i32
    return %c0_i32, %arg0 : i32, i32
  }
}

</mosaic_0001>

<bundles_post_ra>
// kernel: vn_holden_forward.1
= control target key start
LH: loop header
LB: loop body
LE: loop exit
PB: predicated region body
PF: predicated region fallthrough
CT: control target
= control target key end

     0   :  { %vm35_vm0 = vcmask 392192   ;;  %s1152_s0 = inlined_call_operand.vmem [shape: f32[48,128], index: 0, kind: input, shape index: {}]   ;;  %s1153_s1 = inlined_call_operand.vmem [shape: f32[48,48], index: 1, kind: input, shape index: {}]   ;;  %s1154_s2 = inlined_call_operand.vmem [shape: f32[2,96,48], index: 2, kind: input, shape index: {}]   ;;  %s1155_s3 = inlined_call_operand.vmem [shape: f32[2,48,48], index: 3, kind: input, shape index: {}]   ;;  %s1156_s4 = inlined_call_operand.vmem [shape: f32[48,48], index: 4, kind: input, shape index: {}]   ;;  %s1157_s5 = inlined_call_operand.vmem [shape: f32[48,48], index: 5, kind: input, shape index: {}]   ;;  %s1158_s6 = inlined_call_operand.vmem [shape: f32[48,128], index: 6, kind: output, shape index: {}]  }
   0x1   :  { %v34_v0 = vld [vmem:[%s1152_s0 + $0x28] sm:$0xff]  ;;  %v33_v1 = vld [vmem:[%s1152_s0 + $0x20] sm:$0xff]  ;;  %v32_v2 = vld [vmem:[%s1152_s0 + $0x18] sm:$0xff] }
   0x2   :  { %756 = vmatpush.msra.mxu2 %v34_v0  ;;  %755 = vmatpush.msra.mxu1 %v34_v0  ;;  %v31_v3 = vld [vmem:[%s1152_s0 + $0x10] sm:$0xff]  ;;  %v30_v4 = vld [vmem:[%s1152_s0 + $0x8] sm:$0xff]  ;;  %v29_v5 = vld [vmem:[%s1152_s0] sm:$0xff] }
   0x3   :  { %64 = vmatpush.msra.mxu0 %v34_v0  ;;  %v27_v6 = vld [vmem:[%s1153_s1 + $0x20] sm:$0xff]  ;;  %v25_v7 = vld [vmem:[%s1153_s1 + $0x10] sm:$0xff]  ;;  %v28_v9 = vld [vmem:[%s1153_s1 + $0x28] sm:$0xff] }
   0x4   :  { %758 = vmatpush.msra.mxu2 %v33_v1  ;;  %757 = vmatpush.msra.mxu1 %v33_v1  ;;  %v23_v8 = vld [vmem:[%s1153_s1] sm:$0xff]  ;;  %v26_v10 = vld [vmem:[%s1153_s1 + $0x18] sm:$0xff]  ;;  %v24_v11 = vld [vmem:[%s1153_s1 + $0x8] sm:$0xff] }
   0x5   :  { %65 = vmatpush.msra.mxu0 %v33_v1  ;;  %v89_v18 = vld [vmem:[%s1154_s2] sm:$0xff]  ;;  %v90_v19 = vld [vmem:[%s1154_s2 + $0x8] sm:$0xff]  ;;  %v91_v20 = vld [vmem:[%s1154_s2 + $0x10] sm:$0xff] }
   0x6   :  { %760 = vmatpush.msra.mxu2 %v32_v2  ;;  %759 = vmatpush.msra.mxu1 %v32_v2  ;;  %v92_v21 = vld [vmem:[%s1154_s2 + $0x18] sm:$0xff]  ;;  %v93_v22 = vld [vmem:[%s1154_s2 + $0x20] sm:$0xff]  ;;  %v94_v23 = vld [vmem:[%s1154_s2 + $0x28] sm:$0xff] }
   0x7   :  { %66 = vmatpush.msra.mxu0 %v32_v2  ;;  %v95_v24 = vld [vmem:[%s1154_s2 + $0x30] sm:$0xff]  ;;  %v96_v25 = vld [vmem:[%s1154_s2 + $0x38] sm:$0xff]  ;;  %v97_v26 = vld [vmem:[%s1154_s2 + $0x40] sm:$0xff] }
   0x8   :  { %762 = vmatpush.msra.mxu2 %v31_v3  ;;  %761 = vmatpush.msra.mxu1 %v31_v3  ;;  %v98_v27 = vld [vmem:[%s1154_s2 + $0x48] sm:$0xff]  ;;  %v99_v28 = vld [vmem:[%s1154_s2 + $0x50] sm:$0xff]  ;;  %v100_v29 = vld [vmem:[%s1154_s2 + $0x58] sm:$0xff] }
   0x9   :  { %67 = vmatpush.msra.mxu0 %v31_v3 }
   0xa   :  { %764 = vmatpush.msra.mxu2 %v30_v4  ;;  %763 = vmatpush.msra.mxu1 %v30_v4 }
   0xb   :  { %68 = vmatpush.msra.mxu0 %v30_v4 }
   0xc   :  { %766 = vmatpush.msra.mxu2 %v29_v5  ;;  %765 = vmatpush.msra.mxu1 %v29_v5 }
   0xd   :  { %687 = vmatmul.msk.f32.vlgmr.msra.gmra.mxu2 %vm35_vm0, %v27_v6  ;;  %685 = vmatmul.msk.f32.vlgmr.msra.gmra.mxu1 %vm35_vm0, %v25_v7 }
   0xe   :  { %69 = vmatpush.msra.mxu0 %v29_v5 }
   0xf   :  { %683 = vmatmul.msk.f32.vlgmr.msra.gmra.mxu0 %vm35_vm0, %v23_v8 }
  0x15   :  { %688 = vmatmul.msk.f32.gmra.mxu2 %vm35_vm0, %v28_v9  ;;  %686 = vmatmul.msk.f32.gmra.mxu1 %vm35_vm0, %v26_v10 }
  0x17   :  { %684 = vmatmul.msk.f32.gmra.mxu0 %vm35_vm0, %v24_v11 }
  0x8a   :  { %v858_v13 = vpop.f32.mrf.mxu1 }
  0x8c   :  { %v860_v14 = vpop.f32.mrf.mxu0 }
  0x90   :  { %v856_v12 = vpop.f32.mrf.mxu2 }
  0x92   :  { %v865_v16 = vpop.f32.mrf.mxu1 }
  0x94   :  { %v869_v17 = vpop.f32.mrf.mxu0 }
  0x98   :  { %v862_v15 = vpop.f32.mrf.mxu2 }
  0x99   :  { %147 = vmatpush.msrb.mxu1 %v862_v15 }
  0x9b   :  { %148 = vmatpush.msrb.mxu1 %v856_v12 }
  0x9d   :  { %149 = vmatpush.msrb.mxu1 %v865_v16 }
  0x9f   :  { %150 = vmatpush.msrb.mxu1 %v858_v13 }
  0xa1   :  { %151 = vmatpush.msrb.mxu1 %v869_v17 }
  0xa3   :  { %152 = vmatpush.msrb.mxu1 %v860_v14 }
  0xa4   :  { %689 = vmatmul.msk.f32.vlgmr.msrb.gmra.mxu1 %vm35_vm0, %v89_v18 }
  0xac   :  { %690 = vmatmul.msk.f32.gmra.mxu1 %vm35_vm0, %v90_v19 }
  0xb4   :  { %691 = vmatmul.msk.f32.gmra.mxu1 %vm35_vm0, %v91_v20 }
  0xbc   :  { %692 = vmatmul.msk.f32.gmra.mxu1 %vm35_vm0, %v92_v21 }
  0xc4   :  { %693 = vmatmul.msk.f32.gmra.mxu1 %vm35_vm0, %v93_v22 }
  0xcc   :  { %694 = vmatmul.msk.f32.gmra.mxu1 %vm35_vm0, %v94_v23 }
  0xd4   :  { %695 = vmatmul.msk.f32.gmra.mxu1 %vm35_vm0, %v95_v24 }
  0xdc   :  { %696 = vmatmul.msk.f32.gmra.mxu1 %vm35_vm0, %v96_v25 }
  0xe4   :  { %697 = vmatmul.msk.f32.gmra.mxu1 %vm35_vm0, %v97_v26  ;;  %v234_v26 = vld [vmem:[%s1155_s3] sm:$0xff] }
  0xec   :  { %698 = vmatmul.msk.f32.gmra.mxu1 %vm35_vm0, %v98_v27  ;;  %v235_v27 = vld [vmem:[%s1155_s3 + $0x8] sm:$0xff] }
  0xf4   :  { %699 = vmatmul.msk.f32.gmra.mxu1 %vm35_vm0, %v99_v28  ;;  %v236_v28 = vld [vmem:[%s1155_s3 + $0x10] sm:$0xff] }
  0xfc   :  { %700 = vmatmul.msk.f32.gmra.mxu1 %vm35_vm0, %v100_v29  ;;  %v237_v29 = vld [vmem:[%s1155_s3 + $0x18] sm:$0xff] }
 0x121   :  { %v922_v30 = vpop.f32.mrf.mxu1 }
 0x129   :  { %v157_v31 = vpop.f32.mrf.mxu1 }
 0x131   :  { %v160_v32 = vpop.f32.mrf.mxu1 }
 0x139   :  { %v163_v33 = vpop.f32.mrf.mxu1 }
 0x141   :  { %v166_v34 = vpop.f32.mrf.mxu1 }
 0x149   :  { %v169_v35 = vpop.f32.mrf.mxu1 }
 0x151   :  { %v172_v36 = vpop.f32.mrf.mxu1 }
 0x152   :  { %v200_v41 = vmul.f32 %v172_v36, %v172_v36  ;;  %v190_v50 = vmul.f32 %v172_v36, %v922_v30 }
 0x159   :  { %v175_v37 = vpop.f32.mrf.mxu1 }
 0x15a   :  { %v201_v49 = vmul.f32 %v175_v37, %v175_v37  ;;  %v191_v62 = vmul.f32 %v175_v37, %v157_v31 }
 0x161   :  { %v178_v38 = vpop.f32.mrf.mxu1 }
 0x162   :  { %v202_v40 = vmul.f32 %v178_v38, %v178_v38  ;;  %v192_v48 = vmul.f32 %v178_v38, %v160_v32 }
 0x164   :  { %v204_v43 = vadd.f32 %v202_v40, %v200_v41  ;;  %v194_v55 = vadd.f32 %v192_v48, %v190_v50  ;;  %v717_v48 = vld [vmem:[%s1154_s2 + $0xb0] sm:$0xff] }
 0x169   :  { %v181_v39 = vpop.f32.mrf.mxu1 }
 0x16a   :  { %v203_v46 = vmul.f32 %v181_v39, %v181_v39  ;;  %v193_v60 = vmul.f32 %v181_v39, %v163_v33 }
 0x16c   :  { %v205_v53 = vadd.f32 %v203_v46, %v201_v49  ;;  %v195_v1 = vadd.f32 %v193_v60, %v191_v62  ;;  %v715_v46 = vld [vmem:[%s1154_s2 + $0xa0] sm:$0xff]  ;;  %v718_v49 = vld [vmem:[%s1154_s2 + $0xb8] sm:$0xff] }
 0x171   :  { %v184_v42 = vpop.f32.mrf.mxu1 }
 0x172   :  { %v206_v44 = vmul.f32 %v184_v42, %v184_v42  ;;  %v196_v51 = vmul.f32 %v184_v42, %v166_v34 }
 0x174   :  { %v208_v45 = vadd.f32 %v206_v44, %v204_v43  ;;  %v198_v57 = vadd.f32 %v196_v51, %v194_v55  ;;  %v712_v43 = vld [vmem:[%s1154_s2 + $0x88] sm:$0xff]  ;;  %v713_v44 = vld [vmem:[%s1154_s2 + $0x90] sm:$0xff] }
 0x176   :  { %v210_v47 = vadd.f32 1e-06, %v208_v45  ;;  %vm216_vm1 = vcmp.lt.f32.partialorder %v198_v57, 0.0  ;;  %v714_v45 = vld [vmem:[%s1154_s2 + $0x98] sm:$0xff] }
 0x178   :  { %767 = vrcp.f32 %v210_v47  ;;  %v716_v47 = vld [vmem:[%s1154_s2 + $0xa8] sm:$0xff] }
 0x179   :  { %v187_v52 = vpop.f32.mrf.mxu1 }
 0x17a   :  { %v207_v54 = vmul.f32 %v187_v52, %v187_v52  ;;  %v197_v63 = vmul.f32 %v187_v52, %v169_v35 }
 0x17c   :  { %v209_v56 = vadd.f32 %v207_v54, %v205_v53  ;;  %v199_v4 = vadd.f32 %v197_v63, %v195_v1 }
 0x17e   :  { %v768_v58 = vpop.eup %767  ;;  %v211_v59 = vadd.f32 1e-06, %v209_v56  ;;  %vm217_vm2 = vcmp.lt.f32.partialorder %v199_v4, 0.0 }
 0x17f   :  { %v214_v61 = vmul.f32 %v768_v58, %v198_v57 }
 0x180   :  { %769 = vrcp.f32 %v211_v59 }
 0x181   :  { %v218_v0 = vmul.f32 0.8, %v214_v61 }
 0x183   :  { %v220_v2 = vsel %vm216_vm1, %v218_v0, 0.0 }
 0x184   :  { %v222_v3 = vmul.f32 %v220_v2, %v172_v36  ;;  %v226_v10 = vmul.f32 %v220_v2, %v184_v42  ;;  %v224_v20 = vmul.f32 %v220_v2, %v178_v38 }
 0x186   :  { %v770_v5 = vpop.eup %769  ;;  %v232_v19 = vsub.f32 %v166_v34, %v226_v10  ;;  %v230_v23 = vsub.f32 %v160_v32, %v224_v20  ;;  %v228_v25 = vsub.f32 %v922_v30, %v222_v3  ;;  %v238_v30 = vld [vmem:[%s1155_s3 + $0x20] sm:$0xff] }
 0x187   :  { %v215_v6 = vmul.f32 %v770_v5, %v199_v4 }
 0x189   :  { %v219_v7 = vmul.f32 0.8, %v215_v6 }
 0x18b   :  { %v221_v8 = vsel %vm217_vm2, %v219_v7, 0.0 }
 0x18c   :  { %v227_v9 = vmul.f32 %v221_v8, %v187_v52  ;;  %v225_v18 = vmul.f32 %v221_v8, %v181_v39  ;;  %v223_v22 = vmul.f32 %v221_v8, %v175_v37 }
 0x18e   :  { %v233_v11 = vsub.f32 %v169_v35, %v227_v9  ;;  %v231_v21 = vsub.f32 %v163_v33, %v225_v18  ;;  %v229_v24 = vsub.f32 %v157_v31, %v223_v22  ;;  %v239_v31 = vld [vmem:[%s1155_s3 + $0x28] sm:$0xff] }
 0x190   :  { %268 = vmatpush.msrb.mxu2 %v233_v11 }
 0x192   :  { %269 = vmatpush.msrb.mxu2 %v232_v19 }
 0x194   :  { %270 = vmatpush.msrb.mxu2 %v231_v21 }
 0x196   :  { %271 = vmatpush.msrb.mxu2 %v230_v23 }
 0x198   :  { %272 = vmatpush.msrb.mxu2 %v229_v24 }
 0x19a   :  { %273 = vmatpush.msrb.mxu2 %v228_v25 }
 0x19b   :  { %701 = vmatmul.msk.f32.vlgmr.msrb.gmra.mxu2 %vm35_vm0, %v234_v26 }
 0x1a3   :  { %702 = vmatmul.msk.f32.gmra.mxu2 %vm35_vm0, %v235_v27 }
 0x1ab   :  { %703 = vmatmul.msk.f32.gmra.mxu2 %vm35_vm0, %v236_v28 }
 0x1b3   :  { %704 = vmatmul.msk.f32.gmra.mxu2 %vm35_vm0, %v237_v29 }
 0x1bb   :  { %705 = vmatmul.msk.f32.gmra.mxu2 %vm35_vm0, %v238_v30 }
 0x1c3   :  { %706 = vmatmul.msk.f32.gmra.mxu2 %vm35_vm0, %v239_v31 }
 0x21e   :  { %v275_v32 = vpop.f32.mrf.mxu2 }
 0x226   :  { %v278_v33 = vpop.f32.mrf.mxu2 }
 0x227   :  { %v966_v42 = vadd.f32 %v278_v33, %v869_v17  ;;  %v711_v17 = vld [vmem:[%s1154_s2 + $0x80] sm:$0xff] }
 0x22e   :  { %v281_v34 = vpop.f32.mrf.mxu2 }
 0x22f   :  { %v962_v41 = vadd.f32 %v281_v34, %v858_v13  ;;  %v708_v13 = vld [vmem:[%s1154_s2 + $0x68] sm:$0xff] }
 0x236   :  { %v284_v35 = vpop.f32.mrf.mxu2 }
 0x237   :  { %v958_v40 = vadd.f32 %v284_v35, %v865_v16  ;;  %v710_v16 = vld [vmem:[%s1154_s2 + $0x78] sm:$0xff] }
 0x23e   :  { %v287_v36 = vpop.f32.mrf.mxu2 }
 0x23f   :  { %v954_v39 = vadd.f32 %v287_v36, %v856_v12  ;;  %v970_v12 = vadd.f32 %v275_v32, %v860_v14  ;;  %v709_v14 = vld [vmem:[%s1154_s2 + $0x70] sm:$0xff] }
 0x246   :  { %v290_v37 = vpop.f32.mrf.mxu2 }
 0x247   :  { %v951_v38 = vadd.f32 %v290_v37, %v862_v15  ;;  %v707_v15 = vld [vmem:[%s1154_s2 + $0x60] sm:$0xff] }
 0x249   :  { %358 = vmatpush.msra.mxu3 %v951_v38 }
 0x24b   :  { %359 = vmatpush.msra.mxu3 %v954_v39 }
 0x24d   :  { %360 = vmatpush.msra.mxu3 %v958_v40 }
 0x24f   :  { %361 = vmatpush.msra.mxu3 %v962_v41 }
 0x251   :  { %362 = vmatpush.msra.mxu3 %v966_v42 }
 0x253   :  { %363 = vmatpush.msra.mxu3 %v970_v12 }
 0x254   :  { %719 = vmatmul.msk.f32.vlgmr.msra.gmra.mxu3 %vm35_vm0, %v707_v15 }
 0x25c   :  { %720 = vmatmul.msk.f32.gmra.mxu3 %vm35_vm0, %v708_v13 }
 0x264   :  { %721 = vmatmul.msk.f32.gmra.mxu3 %vm35_vm0, %v709_v14 }
 0x26c   :  { %722 = vmatmul.msk.f32.gmra.mxu3 %vm35_vm0, %v710_v16 }
 0x274   :  { %723 = vmatmul.msk.f32.gmra.mxu3 %vm35_vm0, %v711_v17 }
 0x27c   :  { %724 = vmatmul.msk.f32.gmra.mxu3 %vm35_vm0, %v712_v43 }
 0x284   :  { %725 = vmatmul.msk.f32.gmra.mxu3 %vm35_vm0, %v713_v44 }
 0x28c   :  { %726 = vmatmul.msk.f32.gmra.mxu3 %vm35_vm0, %v714_v45 }
 0x294   :  { %727 = vmatmul.msk.f32.gmra.mxu3 %vm35_vm0, %v715_v46  ;;  %v731_v46 = vld [vmem:[%s1155_s3 + $0x30] sm:$0xff] }
 0x29c   :  { %728 = vmatmul.msk.f32.gmra.mxu3 %vm35_vm0, %v716_v47  ;;  %v732_v47 = vld [vmem:[%s1155_s3 + $0x38] sm:$0xff] }
 0x2a4   :  { %729 = vmatmul.msk.f32.gmra.mxu3 %vm35_vm0, %v717_v48  ;;  %v733_v48 = vld [vmem:[%s1155_s3 + $0x40] sm:$0xff] }
 0x2ac   :  { %730 = vmatmul.msk.f32.gmra.mxu3 %vm35_vm0, %v718_v49  ;;  %v734_v49 = vld [vmem:[%s1155_s3 + $0x48] sm:$0xff] }
 0x2d7   :  { %v1022_v50 = vpop.f32.mrf.mxu3 }
 0x2df   :  { %v368_v51 = vpop.f32.mrf.mxu3 }
 0x2e7   :  { %v371_v52 = vpop.f32.mrf.mxu3 }
 0x2ef   :  { %v374_v53 = vpop.f32.mrf.mxu3 }
 0x2f7   :  { %v377_v54 = vpop.f32.mrf.mxu3 }
 0x2ff   :  { %v380_v55 = vpop.f32.mrf.mxu3 }
 0x307   :  { %v383_v56 = vpop.f32.mrf.mxu3 }
 0x308   :  { %v411_v61 = vmul.f32 %v383_v56, %v383_v56  ;;  %v401_v6 = vmul.f32 %v383_v56, %v1022_v50 }
 0x30f   :  { %v386_v57 = vpop.f32.mrf.mxu3 }
 0x310   :  { %v412_v5 = vmul.f32 %v386_v57, %v386_v57  ;;  %v402_v24 = vmul.f32 %v386_v57, %v368_v51 }
 0x317   :  { %v389_v58 = vpop.f32.mrf.mxu3 }
 0x318   :  { %v413_v60 = vmul.f32 %v389_v58, %v389_v58  ;;  %v403_v4 = vmul.f32 %v389_v58, %v371_v52 }
 0x31a   :  { %v415_v63 = vadd.f32 %v413_v60, %v411_v61  ;;  %v405_v11 = vadd.f32 %v403_v4, %v401_v6 }
 0x31f   :  { %v392_v59 = vpop.f32.mrf.mxu3 }
 0x320   :  { %v414_v2 = vmul.f32 %v392_v59, %v392_v59  ;;  %v404_v22 = vmul.f32 %v392_v59, %v374_v53 }
 0x322   :  { %v416_v9 = vadd.f32 %v414_v2, %v412_v5  ;;  %v406_v27 = vadd.f32 %v404_v22, %v402_v24 }
 0x327   :  { %v395_v62 = vpop.f32.mrf.mxu3 }
 0x328   :  { %v417_v0 = vmul.f32 %v395_v62, %v395_v62  ;;  %v407_v7 = vmul.f32 %v395_v62, %v377_v54 }
 0x32a   :  { %v419_v1 = vadd.f32 %v417_v0, %v415_v63  ;;  %v409_v19 = vadd.f32 %v407_v7, %v405_v11  ;;  %v516_v63 = vld [vmem:[%s1156_s4 + $0x28] sm:$0xff] }
 0x32c   :  { %v421_v3 = vadd.f32 1e-06, %v419_v1  ;;  %vm427_vm3 = vcmp.lt.f32.partialorder %v409_v19, 0.0 }
 0x32e   :  { %771 = vrcp.f32 %v421_v3 }
 0x32f   :  { %v398_v8 = vpop.f32.mrf.mxu3 }
 0x330   :  { %v418_v10 = vmul.f32 %v398_v8, %v398_v8  ;;  %v408_v25 = vmul.f32 %v398_v8, %v380_v55 }
 0x332   :  { %v420_v18 = vadd.f32 %v418_v10, %v416_v9  ;;  %v410_v30 = vadd.f32 %v408_v25, %v406_v27 }
 0x334   :  { %v772_v20 = vpop.eup %771  ;;  %v422_v21 = vadd.f32 1e-06, %v420_v18  ;;  %vm428_vm4 = vcmp.lt.f32.partialorder %v410_v30, 0.0 }
 0x335   :  { %v425_v23 = vmul.f32 %v772_v20, %v409_v19 }
 0x336   :  { %773 = vrcp.f32 %v422_v21 }
 0x337   :  { %v429_v26 = vmul.f32 0.8, %v425_v23 }
 0x339   :  { %v431_v28 = vsel %vm427_vm3, %v429_v26, 0.0 }
 0x33a   :  { %v433_v29 = vmul.f32 %v431_v28, %v383_v56  ;;  %v437_v36 = vmul.f32 %v431_v28, %v395_v62  ;;  %v435_v14 = vmul.f32 %v431_v28, %v389_v58 }
 0x33c   :  { %v774_v31 = vpop.eup %773  ;;  %v443_v13 = vsub.f32 %v377_v54, %v437_v36  ;;  %v441_v43 = vsub.f32 %v371_v52, %v435_v14  ;;  %v439_v45 = vsub.f32 %v1022_v50, %v433_v29  ;;  %v735_v50 = vld [vmem:[%s1155_s3 + $0x50] sm:$0xff] }
 0x33d   :  { %v426_v32 = vmul.f32 %v774_v31, %v410_v30 }
 0x33f   :  { %v430_v33 = vmul.f32 0.8, %v426_v32 }
 0x341   :  { %v432_v34 = vsel %vm428_vm4, %v430_v33, 0.0 }
 0x342   :  { %v438_v35 = vmul.f32 %v432_v34, %v398_v8  ;;  %v436_v15 = vmul.f32 %v432_v34, %v392_v59  ;;  %v434_v17 = vmul.f32 %v432_v34, %v386_v57 }
 0x344   :  { %v444_v37 = vsub.f32 %v380_v55, %v438_v35  ;;  %v442_v16 = vsub.f32 %v374_v53, %v436_v15  ;;  %v440_v44 = vsub.f32 %v368_v51, %v434_v17  ;;  %v736_v51 = vld [vmem:[%s1155_s3 + $0x58] sm:$0xff] }
 0x346   :  { %480 = vmatpush.msrb.mxu0 %v444_v37 }
 0x348   :  { %481 = vmatpush.msrb.mxu0 %v443_v13 }
 0x34a   :  { %482 = vmatpush.msrb.mxu0 %v442_v16 }
 0x34c   :  { %483 = vmatpush.msrb.mxu0 %v441_v43 }
 0x34e   :  { %484 = vmatpush.msrb.mxu0 %v440_v44 }
 0x350   :  { %485 = vmatpush.msrb.mxu0 %v439_v45 }
 0x351   :  { %737 = vmatmul.msk.f32.vlgmr.msrb.gmra.mxu0 %vm35_vm0, %v731_v46 }
 0x359   :  { %738 = vmatmul.msk.f32.gmra.mxu0 %vm35_vm0, %v732_v47 }
 0x361   :  { %739 = vmatmul.msk.f32.gmra.mxu0 %vm35_vm0, %v733_v48 }
 0x369   :  { %740 = vmatmul.msk.f32.gmra.mxu0 %vm35_vm0, %v734_v49 }
 0x371   :  { %741 = vmatmul.msk.f32.gmra.mxu0 %vm35_vm0, %v735_v50 }
 0x379   :  { %742 = vmatmul.msk.f32.gmra.mxu0 %vm35_vm0, %v736_v51 }
 0x3ce   :  { %v487_v52 = vpop.f32.mrf.mxu0 }
 0x3d6   :  { %v490_v53 = vpop.f32.mrf.mxu0 }
 0x3d7   :  { %v1066_v62 = vadd.f32 %v490_v53, %v966_v42  ;;  %v514_v42 = vld [vmem:[%s1156_s4 + $0x18] sm:$0xff] }
 0x3de   :  { %v493_v54 = vpop.f32.mrf.mxu0 }
 0x3df   :  { %v1062_v61 = vadd.f32 %v493_v54, %v962_v41  ;;  %v513_v41 = vld [vmem:[%s1156_s4 + $0x10] sm:$0xff]  ;;  %v614_v54 = vld [vmem:[%s1157_s5] sm:$0xff] }
 0x3e6   :  { %v496_v55 = vpop.f32.mrf.mxu0 }
 0x3e7   :  { %v1058_v60 = vadd.f32 %v496_v55, %v958_v40  ;;  %v512_v40 = vld [vmem:[%s1156_s4 + $0x8] sm:$0xff] }
 0x3e8   :  { %v615_v55 = vld [vmem:[%s1157_s5 + $0x8] sm:$0xff] }
 0x3ee   :  { %v499_v56 = vpop.f32.mrf.mxu0 }
 0x3ef   :  { %v1054_v59 = vadd.f32 %v499_v56, %v954_v39  ;;  %v511_v39 = vld [vmem:[%s1156_s4] sm:$0xff]  ;;  %v616_v56 = vld [vmem:[%s1157_s5 + $0x10] sm:$0xff] }
 0x3f6   :  { %v502_v57 = vpop.f32.mrf.mxu0 }
 0x3f7   :  { %v1051_v58 = vadd.f32 %v502_v57, %v951_v38  ;;  %v1070_v38 = vadd.f32 %v487_v52, %v970_v12  ;;  %v515_v12 = vld [vmem:[%s1156_s4 + $0x20] sm:$0xff]  ;;  %v617_v57 = vld [vmem:[%s1157_s5 + $0x18] sm:$0xff] }
 0x3f9   :  { %545 = vmatpush.msra.mxu2 %v1051_v58 }
 0x3fb   :  { %546 = vmatpush.msra.mxu2 %v1054_v59 }
 0x3fd   :  { %547 = vmatpush.msra.mxu2 %v1058_v60 }
 0x3ff   :  { %548 = vmatpush.msra.mxu2 %v1062_v61 }
 0x401   :  { %549 = vmatpush.msra.mxu2 %v1066_v62 }
 0x403   :  { %550 = vmatpush.msra.mxu2 %v1070_v38 }
 0x404   :  { %743 = vmatmul.msk.f32.vlgmr.msra.gmra.mxu2 %vm35_vm0, %v511_v39 }
 0x40c   :  { %744 = vmatmul.msk.f32.gmra.mxu2 %vm35_vm0, %v512_v40 }
 0x414   :  { %745 = vmatmul.msk.f32.gmra.mxu2 %vm35_vm0, %v513_v41 }
 0x41c   :  { %746 = vmatmul.msk.f32.gmra.mxu2 %vm35_vm0, %v514_v42 }
 0x424   :  { %747 = vmatmul.msk.f32.gmra.mxu2 %vm35_vm0, %v515_v12 }
 0x42c   :  { %748 = vmatmul.msk.f32.gmra.mxu2 %vm35_vm0, %v516_v63 }
 0x487   :  { %v552_v0 = vpop.f32.mrf.mxu2 }
 0x488   :  { %v580_v5 = vmul.f32 %v552_v0, %v552_v0  ;;  %v570_v23 = vmul.f32 %v552_v0, %v1070_v38 }
 0x48f   :  { %v555_v1 = vpop.f32.mrf.mxu2 }
 0x490   :  { %v581_v18 = vmul.f32 %v555_v1, %v555_v1  ;;  %v571_v31 = vmul.f32 %v555_v1, %v1066_v62 }
 0x497   :  { %v558_v2 = vpop.f32.mrf.mxu2 }
 0x498   :  { %v582_v4 = vmul.f32 %v558_v2, %v558_v2  ;;  %v572_v19 = vmul.f32 %v558_v2, %v1062_v61 }
 0x49a   :  { %v584_v7 = vadd.f32 %v582_v4, %v580_v5  ;;  %v574_v26 = vadd.f32 %v572_v19, %v570_v23 }
 0x49f   :  { %v561_v3 = vpop.f32.mrf.mxu2 }
 0x4a0   :  { %v583_v10 = vmul.f32 %v561_v3, %v561_v3  ;;  %v573_v29 = vmul.f32 %v561_v3, %v1058_v60 }
 0x4a2   :  { %v585_v21 = vadd.f32 %v583_v10, %v581_v18  ;;  %v575_v34 = vadd.f32 %v573_v29, %v571_v31 }
 0x4a7   :  { %v564_v6 = vpop.f32.mrf.mxu2 }
 0x4a8   :  { %v586_v8 = vmul.f32 %v564_v6, %v564_v6  ;;  %v576_v24 = vmul.f32 %v564_v6, %v1054_v59 }
 0x4aa   :  { %v588_v9 = vadd.f32 %v586_v8, %v584_v7  ;;  %v578_v30 = vadd.f32 %v576_v24, %v574_v26 }
 0x4ac   :  { %v590_v11 = vadd.f32 1e-06, %v588_v9  ;;  %vm596_vm5 = vcmp.lt.f32.partialorder %v578_v30, 0.0 }
 0x4ae   :  { %775 = vrcp.f32 %v590_v11 }
 0x4af   :  { %v567_v20 = vpop.f32.mrf.mxu2 }
 0x4b0   :  { %v587_v22 = vmul.f32 %v567_v20, %v567_v20  ;;  %v577_v33 = vmul.f32 %v567_v20, %v1051_v58 }
 0x4b2   :  { %v589_v25 = vadd.f32 %v587_v22, %v585_v21  ;;  %v579_v36 = vadd.f32 %v577_v33, %v575_v34 }
 0x4b4   :  { %v776_v27 = vpop.eup %775  ;;  %v591_v28 = vadd.f32 1e-06, %v589_v25  ;;  %vm597_vm6 = vcmp.lt.f32.partialorder %v579_v36, 0.0 }
 0x4b5   :  { %v594_v32 = vmul.f32 %v776_v27, %v578_v30 }
 0x4b6   :  { %777 = vrcp.f32 %v591_v28 }
 0x4b7   :  { %v598_v35 = vmul.f32 0.8, %v594_v32 }
 0x4b9   :  { %v600_v13 = vsel %vm596_vm5, %v598_v35, 0.0 }
 0x4ba   :  { %v606_v17 = vmul.f32 %v600_v13, %v564_v6  ;;  %v604_v47 = vmul.f32 %v600_v13, %v558_v2  ;;  %v602_v51 = vmul.f32 %v600_v13, %v552_v0 }
 0x4bc   :  { %v778_v37 = vpop.eup %777  ;;  %v612_v46 = vsub.f32 %v1054_v59, %v606_v17  ;;  %v610_v50 = vsub.f32 %v1062_v61, %v604_v47  ;;  %v608_v53 = vsub.f32 %v1070_v38, %v602_v51  ;;  %v619_v59 = vld [vmem:[%s1157_s5 + $0x28] sm:$0xff] }
 0x4bd   :  { %v595_v15 = vmul.f32 %v778_v37, %v579_v36 }
 0x4bf   :  { %v599_v14 = vmul.f32 0.8, %v595_v15 }
 0x4c1   :  { %v601_v16 = vsel %vm597_vm6, %v599_v14, 0.0 }
 0x4c2   :  { %v607_v43 = vmul.f32 %v601_v16, %v567_v20  ;;  %v605_v45 = vmul.f32 %v601_v16, %v561_v3  ;;  %v603_v49 = vmul.f32 %v601_v16, %v555_v1 }
 0x4c4   :  { %v613_v44 = vsub.f32 %v1051_v58, %v607_v43  ;;  %v611_v48 = vsub.f32 %v1058_v60, %v605_v45  ;;  %v609_v52 = vsub.f32 %v1066_v62, %v603_v49  ;;  %v618_v58 = vld [vmem:[%s1157_s5 + $0x20] sm:$0xff] }
 0x4c6   :  { %648 = vmatpush.msra.mxu0 %v613_v44 }
 0x4c8   :  { %649 = vmatpush.msra.mxu0 %v612_v46 }
 0x4ca   :  { %650 = vmatpush.msra.mxu0 %v611_v48 }
 0x4cc   :  { %651 = vmatpush.msra.mxu0 %v610_v50 }
 0x4ce   :  { %652 = vmatpush.msra.mxu0 %v609_v52 }
 0x4d0   :  { %653 = vmatpush.msra.mxu0 %v608_v53 }
 0x4d1   :  { %749 = vmatmul.msk.f32.vlgmr.msra.gmra.mxu0 %vm35_vm0, %v614_v54 }
 0x4d9   :  { %750 = vmatmul.msk.f32.gmra.mxu0 %vm35_vm0, %v615_v55 }
 0x4e1   :  { %751 = vmatmul.msk.f32.gmra.mxu0 %vm35_vm0, %v616_v56 }
 0x4e9   :  { %752 = vmatmul.msk.f32.gmra.mxu0 %vm35_vm0, %v617_v57 }
 0x4f1   :  { %753 = vmatmul.msk.f32.gmra.mxu0 %vm35_vm0, %v618_v58 }
 0x4f9   :  { %754 = vmatmul.msk.f32.gmra.mxu0 %vm35_vm0, %v619_v59 }
 0x54e   :  { %v655_v60 = vpop.f32.mrf.mxu0 }
 0x54f   :  { %673 = vst [vmem:[%s1158_s6] sm:$0xff] %v655_v60 }
 0x556   :  { %v658_v61 = vpop.f32.mrf.mxu0 }
 0x557   :  { %674 = vst [vmem:[%s1158_s6 + $0x8] sm:$0xff] %v658_v61 }
 0x55e   :  { %v661_v62 = vpop.f32.mrf.mxu0 }
 0x55f   :  { %675 = vst [vmem:[%s1158_s6 + $0x10] sm:$0xff] %v661_v62 }
 0x566   :  { %v664_v38 = vpop.f32.mrf.mxu0 }
 0x567   :  { %676 = vst [vmem:[%s1158_s6 + $0x18] sm:$0xff] %v664_v38 }
 0x56e   :  { %v667_v39 = vpop.f32.mrf.mxu0 }
 0x56f   :  { %677 = vst [vmem:[%s1158_s6 + $0x20] sm:$0xff] %v667_v39 }
 0x576   :  { %v670_v40 = vpop.f32.mrf.mxu0 }
 0x577   :  { %678 = vst [vmem:[%s1158_s6 + $0x28] sm:$0xff] %v670_v40 }

</bundles_post_ra>
